<compile_context>
chip_gen: v6e
topology: v6e:2x2x1
jax: 0.10.0
libtpu: 0.0.40
codegen_flags: <defaults>
</compile_context>

<pallas_src>
import jax
import jax.numpy as jnp
from jax.experimental import pallas as pl
from jax.experimental.pallas import tpu as pltpu

LANES = 128      # vreg lane width (layout padding inside VMEM)
SUBLANES = 8     # vreg sublane count
B_TILE = 8       # batch rows per grid step == sublane-dense output block
VMEM_LIMIT_BYTES = 32 * 1024 * 1024   # <= scoped default on v6e/v7x, raisable on v5e


def _cbow_kernel(idx_ref, table_ref, o_ref):
    """One grid step = one tile of B_TILE batch rows (all S tokens of each row).

    idx_ref  : (B_pad, S) int32, SMEM (scalar prefetch) token ids.
    table_ref: (V, n_out) f32, VMEM-resident folded table (E @ W.T).
    o_ref    : (B_TILE, n_out) f32 output block for this batch tile.
    """
    bt = pl.program_id(0)
    seq_len = idx_ref.shape[1]
    n_out = o_ref.shape[1]

    for b in range(B_TILE):                              # static unroll over sublanes
        row = bt * B_TILE + b

        def body(s, acc):
            tok = idx_ref[row, s]                        # scalar read from SMEM
            return acc + table_ref[pl.ds(tok, 1), :]     # (1, n_out) VMEM gather

        acc = jax.lax.fori_loop(
            0, seq_len, body, jnp.zeros((1, n_out), jnp.float32), unroll=True)
        o_ref[pl.ds(b, 1), :] = acc


def make_folded_table(emb_table, w):
    """(V, D) @ (D, n_out) -> (V, n_out).

    Only changes when the embedding / linear weights change, so callers can (and
    should) cache it across forwards instead of recomputing per call.
    """
    return jnp.dot(emb_table, w.T, precision=jax.lax.Precision.HIGHEST)


def cbow_forward_folded(indices, folded, bias):
    """indices: (B, S) int; folded: (V, n_out) f32; bias: (n_out,) f32 -> (B, n_out)."""
    B, S = indices.shape
    V, n_out = folded.shape

    if S == 0:  # sum over an empty sequence is 0 -> logits are just the bias
        return jnp.broadcast_to(bias.astype(jnp.float32), (B, n_out))

    # VMEM budget for the resident-table path: Mosaic pads (V, n_out) to
    # (ceil(V/8)*8, ceil(n_out/128)*128) f32 tiles and double-buffers blocks.
    table_tile = pl.cdiv(V, SUBLANES) * SUBLANES * pl.cdiv(n_out, LANES) * LANES * 4
    out_tile = B_TILE * pl.cdiv(n_out, LANES) * LANES * 4
    if 2 * (table_tile + out_tile) > VMEM_LIMIT_BYTES - (4 << 20):
        # TODO(synk): large-vocab fallback -- per-row HBM gather via a scalar-prefetch
        # driven index_map with pipeline_mode=pl.Buffered(4) instead of the
        # VMEM-resident table.
        raise NotImplementedError(
            "folded table does not fit the VMEM-resident fast path")

    # int32 ids, clamped so an out-of-range id cannot read out of bounds
    # (torch.nn.Embedding would raise instead; safe for vocab < 2^31).
    idx32 = jnp.clip(indices.astype(jnp.int32), 0, V - 1)

    # Pad batch to a multiple of the sublane tile; padded rows gather row 0 and are
    # sliced off below.
    B_pad = pl.cdiv(B, B_TILE) * B_TILE
    if B_pad != B:
        idx32 = jnp.pad(idx32, ((0, B_pad - B), (0, 0)))

    out = pl.pallas_call(
        _cbow_kernel,
        out_shape=jax.ShapeDtypeStruct((B_pad, n_out), jnp.float32),
        grid_spec=pltpu.PrefetchScalarGridSpec(
            num_scalar_prefetch=1,
            grid=(B_pad // B_TILE,),
            in_specs=[
                # Whole folded table, loaded once, resident across all grid steps.
                pl.BlockSpec((V, n_out), lambda bt, idx: (0, 0)),
            ],
            out_specs=pl.BlockSpec((B_TILE, n_out), lambda bt, idx: (bt, 0)),
        ),
        compiler_params=pltpu.CompilerParams(
            dimension_semantics=("parallel",),   # batch tiles are independent
            vmem_limit_bytes=VMEM_LIMIT_BYTES),
        cost_estimate=pl.CostEstimate(
            flops=2 * B_pad * S * n_out,
            transcendentals=0,
            bytes_accessed=V * n_out * 4 + B_pad * S * 4 + B_pad * n_out * 4),
    )(idx32, folded)

    return out[:B] + bias


def cbow_logreg_forward(indices, emb_table, w, b):
    """Full CBOWLogReg forward: Embedding gather -> seq-sum -> Linear(D, 2)."""
    return cbow_forward_folded(indices, make_folded_table(emb_table, w), b)


if __name__ == "__main__":
    # Small synthetic config consistent with the module:
    #   vocab = 128, emb_dim = 32, batch = 8, seq_len = 8, n_classes = 2
    VOCAB, EMB_DIM, BATCH, SEQ, NCLS = 128, 32, 8, 8, 2

    key = jax.random.PRNGKey(0)
    k_emb, k_w, k_b, k_idx = jax.random.split(key, 4)

    # Deterministic parameter init (stand-in for TEXT.vocab.vectors + Linear init).
    emb_table = jax.random.normal(k_emb, (VOCAB, EMB_DIM), dtype=jnp.float32)
    w = jax.random.normal(k_w, (NCLS, EMB_DIM), dtype=jnp.float32) * 0.1
    b = jax.random.normal(k_b, (NCLS,), dtype=jnp.float32) * 0.1
    indices = jax.random.randint(k_idx, (BATCH, SEQ), 0, VOCAB, dtype=jnp.int32)

    fwd = jax.jit(cbow_logreg_forward)
    out = jax.block_until_ready(fwd(indices, emb_table, w, b))

    # Plain-JAX reference: embedding gather + seq-sum + Linear (PyTorch order).
    summed = jnp.take(emb_table, indices, axis=0).sum(axis=1)
    ref = jnp.dot(summed, w.T, precision=jax.lax.Precision.HIGHEST) + b

    assert out.shape == (BATCH, NCLS)
    assert jnp.allclose(out, ref, atol=1e-3, rtol=1e-3), float(jnp.max(jnp.abs(out - ref)))
    print("KERNEL_OK")
</pallas_src>

<mosaic_0001>
module attributes {stable_mosaic.version = 11 : i64} {
  func.func @_cbow_kernel(%arg0: i32, %arg1: memref<8x8xi32, #tpu.memory_space<smem>>, %arg2: memref<128x2xf32, #tpu.memory_space<vmem>>, %arg3: memref<8x2xf32, #tpu.memory_space<vmem>>) attributes {dimension_semantics = [#tpu.dimension_semantics<parallel>], iteration_bounds = array<i64: 1>, scalar_prefetch = 1 : i64, scratch_operands = 0 : i64, tpu.core_type = #tpu.core_type<tc>, window_params = [{pipeline_mode = #tpu.pipeline_mode<synchronous>, transform_indices = @transform_0, window_bounds = array<i64: 128, 2>}, {transform_indices = @transform_1, window_bounds = array<i64: 8, 2>}]} {
    %c8_i32 = arith.constant 8 : i32
    %0 = arith.muli %arg0, %c8_i32 : i32
    %c0_i32 = arith.constant 0 : i32
    %1 = arith.addi %0, %c0_i32 : i32
    %cst = arith.constant 0.000000e+00 : f32
    %2 = vector.broadcast %cst : f32 to vector<1x2xf32>
    %c0_i32_0 = arith.constant 0 : i32
    %3 = arith.index_cast %1 : i32 to index
    %4 = arith.index_cast %c0_i32_0 : i32 to index
    %5 = memref.load %arg1[%3, %4] : memref<8x8xi32, #tpu.memory_space<smem>>
    %6 = arith.index_cast %5 : i32 to index
    %c0 = arith.constant 0 : index
    %7 = vector.load %arg2[%6, %c0] : memref<128x2xf32, #tpu.memory_space<vmem>>, vector<1x2xf32>
    %8 = arith.addf %2, %7 : vector<1x2xf32>
    %c1_i32 = arith.constant 1 : i32
    %9 = arith.index_cast %1 : i32 to index
    %10 = arith.index_cast %c1_i32 : i32 to index
    %11 = memref.load %arg1[%9, %10] : memref<8x8xi32, #tpu.memory_space<smem>>
    %12 = arith.index_cast %11 : i32 to index
    %c0_1 = arith.constant 0 : index
    %13 = vector.load %arg2[%12, %c0_1] : memref<128x2xf32, #tpu.memory_space<vmem>>, vector<1x2xf32>
    %14 = arith.addf %8, %13 : vector<1x2xf32>
    %c2_i32 = arith.constant 2 : i32
    %15 = arith.index_cast %1 : i32 to index
    %16 = arith.index_cast %c2_i32 : i32 to index
    %17 = memref.load %arg1[%15, %16] : memref<8x8xi32, #tpu.memory_space<smem>>
    %18 = arith.index_cast %17 : i32 to index
    %c0_2 = arith.constant 0 : index
    %19 = vector.load %arg2[%18, %c0_2] : memref<128x2xf32, #tpu.memory_space<vmem>>, vector<1x2xf32>
    %20 = arith.addf %14, %19 : vector<1x2xf32>
    %c3_i32 = arith.constant 3 : i32
    %21 = arith.index_cast %1 : i32 to index
    %22 = arith.index_cast %c3_i32 : i32 to index
    %23 = memref.load %arg1[%21, %22] : memref<8x8xi32, #tpu.memory_space<smem>>
    %24 = arith.index_cast %23 : i32 to index
    %c0_3 = arith.constant 0 : index
    %25 = vector.load %arg2[%24, %c0_3] : memref<128x2xf32, #tpu.memory_space<vmem>>, vector<1x2xf32>
    %26 = arith.addf %20, %25 : vector<1x2xf32>
    %c4_i32 = arith.constant 4 : i32
    %27 = arith.index_cast %1 : i32 to index
    %28 = arith.index_cast %c4_i32 : i32 to index
    %29 = memref.load %arg1[%27, %28] : memref<8x8xi32, #tpu.memory_space<smem>>
    %30 = arith.index_cast %29 : i32 to index
    %c0_4 = arith.constant 0 : index
    %31 = vector.load %arg2[%30, %c0_4] : memref<128x2xf32, #tpu.memory_space<vmem>>, vector<1x2xf32>
    %32 = arith.addf %26, %31 : vector<1x2xf32>
    %c5_i32 = arith.constant 5 : i32
    %33 = arith.index_cast %1 : i32 to index
    %34 = arith.index_cast %c5_i32 : i32 to index
    %35 = memref.load %arg1[%33, %34] : memref<8x8xi32, #tpu.memory_space<smem>>
    %36 = arith.index_cast %35 : i32 to index
    %c0_5 = arith.constant 0 : index
    %37 = vector.load %arg2[%36, %c0_5] : memref<128x2xf32, #tpu.memory_space<vmem>>, vector<1x2xf32>
    %38 = arith.addf %32, %37 : vector<1x2xf32>
    %c6_i32 = arith.constant 6 : i32
    %39 = arith.index_cast %1 : i32 to index
    %40 = arith.index_cast %c6_i32 : i32 to index
    %41 = memref.load %arg1[%39, %40] : memref<8x8xi32, #tpu.memory_space<smem>>
    %42 = arith.index_cast %41 : i32 to index
    %c0_6 = arith.constant 0 : index
    %43 = vector.load %arg2[%42, %c0_6] : memref<128x2xf32, #tpu.memory_space<vmem>>, vector<1x2xf32>
    %44 = arith.addf %38, %43 : vector<1x2xf32>
    %c7_i32 = arith.constant 7 : i32
    %45 = arith.index_cast %1 : i32 to index
    %46 = arith.index_cast %c7_i32 : i32 to index
    %47 = memref.load %arg1[%45, %46] : memref<8x8xi32, #tpu.memory_space<smem>>
    %48 = arith.index_cast %47 : i32 to index
    %c0_7 = arith.constant 0 : index
    %49 = vector.load %arg2[%48, %c0_7] : memref<128x2xf32, #tpu.memory_space<vmem>>, vector<1x2xf32>
    %50 = arith.addf %44, %49 : vector<1x2xf32>
    %c8_i32_8 = arith.constant 8 : i32
    %c0_9 = arith.constant 0 : index
    %c0_10 = arith.constant 0 : index
    %51 = vector.load %arg3[%c0_9, %c0_10] : memref<8x2xf32, #tpu.memory_space<vmem>>, vector<1x2xf32>
    tpu.vector_store %arg3[%c0_9, %c0_10], %50 {strides = array<i32>} : memref<8x2xf32, #tpu.memory_space<vmem>>, vector<1x2xf32>,
    %c8_i32_11 = arith.constant 8 : i32
    %52 = arith.muli %arg0, %c8_i32_11 : i32
    %c1_i32_12 = arith.constant 1 : i32
    %53 = arith.addi %52, %c1_i32_12 : i32
    %cst_13 = arith.constant 0.000000e+00 : f32
    %54 = vector.broadcast %cst_13 : f32 to vector<1x2xf32>
    %c0_i32_14 = arith.constant 0 : i32
    %55 = arith.index_cast %53 : i32 to index
    %56 = arith.index_cast %c0_i32_14 : i32 to index
    %57 = memref.load %arg1[%55, %56] : memref<8x8xi32, #tpu.memory_space<smem>>
    %58 = arith.index_cast %57 : i32 to index
    %c0_15 = arith.constant 0 : index
    %59 = vector.load %arg2[%58, %c0_15] : memref<128x2xf32, #tpu.memory_space<vmem>>, vector<1x2xf32>
    %60 = arith.addf %54, %59 : vector<1x2xf32>
    %c1_i32_16 = arith.constant 1 : i32
    %61 = arith.index_cast %53 : i32 to index
    %62 = arith.index_cast %c1_i32_16 : i32 to index
    %63 = memref.load %arg1[%61, %62] : memref<8x8xi32, #tpu.memory_space<smem>>
    %64 = arith.index_cast %63 : i32 to index
    %c0_17 = arith.constant 0 : index
    %65 = vector.load %arg2[%64, %c0_17] : memref<128x2xf32, #tpu.memory_space<vmem>>, vector<1x2xf32>
    %66 = arith.addf %60, %65 : vector<1x2xf32>
    %c2_i32_18 = arith.constant 2 : i32
    %67 = arith.index_cast %53 : i32 to index
    %68 = arith.index_cast %c2_i32_18 : i32 to index
    %69 = memref.load %arg1[%67, %68] : memref<8x8xi32, #tpu.memory_space<smem>>
    %70 = arith.index_cast %69 : i32 to index
    %c0_19 = arith.constant 0 : index
    %71 = vector.load %arg2[%70, %c0_19] : memref<128x2xf32, #tpu.memory_space<vmem>>, vector<1x2xf32>
    %72 = arith.addf %66, %71 : vector<1x2xf32>
    %c3_i32_20 = arith.constant 3 : i32
    %73 = arith.index_cast %53 : i32 to index
    %74 = arith.index_cast %c3_i32_20 : i32 to index
    %75 = memref.load %arg1[%73, %74] : memref<8x8xi32, #tpu.memory_space<smem>>
    %76 = arith.index_cast %75 : i32 to index
    %c0_21 = arith.constant 0 : index
    %77 = vector.load %arg2[%76, %c0_21] : memref<128x2xf32, #tpu.memory_space<vmem>>, vector<1x2xf32>
    %78 = arith.addf %72, %77 : vector<1x2xf32>
    %c4_i32_22 = arith.constant 4 : i32
    %79 = arith.index_cast %53 : i32 to index
    %80 = arith.index_cast %c4_i32_22 : i32 to index
    %81 = memref.load %arg1[%79, %80] : memref<8x8xi32, #tpu.memory_space<smem>>
    %82 = arith.index_cast %81 : i32 to index
    %c0_23 = arith.constant 0 : index
    %83 = vector.load %arg2[%82, %c0_23] : memref<128x2xf32, #tpu.memory_space<vmem>>, vector<1x2xf32>
    %84 = arith.addf %78, %83 : vector<1x2xf32>
    %c5_i32_24 = arith.constant 5 : i32
    %85 = arith.index_cast %53 : i32 to index
    %86 = arith.index_cast %c5_i32_24 : i32 to index
    %87 = memref.load %arg1[%85, %86] : memref<8x8xi32, #tpu.memory_space<smem>>
    %88 = arith.index_cast %87 : i32 to index
    %c0_25 = arith.constant 0 : index
    %89 = vector.load %arg2[%88, %c0_25] : memref<128x2xf32, #tpu.memory_space<vmem>>, vector<1x2xf32>
    %90 = arith.addf %84, %89 : vector<1x2xf32>
    %c6_i32_26 = arith.constant 6 : i32
    %91 = arith.index_cast %53 : i32 to index
    %92 = arith.index_cast %c6_i32_26 : i32 to index
    %93 = memref.load %arg1[%91, %92] : memref<8x8xi32, #tpu.memory_space<smem>>
    %94 = arith.index_cast %93 : i32 to index
    %c0_27 = arith.constant 0 : index
    %95 = vector.load %arg2[%94, %c0_27] : memref<128x2xf32, #tpu.memory_space<vmem>>, vector<1x2xf32>
    %96 = arith.addf %90, %95 : vector<1x2xf32>
    %c7_i32_28 = arith.constant 7 : i32
    %97 = arith.index_cast %53 : i32 to index
    %98 = arith.index_cast %c7_i32_28 : i32 to index
    %99 = memref.load %arg1[%97, %98] : memref<8x8xi32, #tpu.memory_space<smem>>
    %100 = arith.index_cast %99 : i32 to index
    %c0_29 = arith.constant 0 : index
    %101 = vector.load %arg2[%100, %c0_29] : memref<128x2xf32, #tpu.memory_space<vmem>>, vector<1x2xf32>
    %102 = arith.addf %96, %101 : vector<1x2xf32>
    %c8_i32_30 = arith.constant 8 : i32
    %c1 = arith.constant 1 : index
    %c0_31 = arith.constant 0 : index
    %103 = vector.load %arg3[%c1, %c0_31] : memref<8x2xf32, #tpu.memory_space<vmem>>, vector<1x2xf32>
    tpu.vector_store %arg3[%c1, %c0_31], %102 {strides = array<i32>} : memref<8x2xf32, #tpu.memory_space<vmem>>, vector<1x2xf32>,
    %c8_i32_32 = arith.constant 8 : i32
    %104 = arith.muli %arg0, %c8_i32_32 : i32
    %c2_i32_33 = arith.constant 2 : i32
    %105 = arith.addi %104, %c2_i32_33 : i32
    %cst_34 = arith.constant 0.000000e+00 : f32
    %106 = vector.broadcast %cst_34 : f32 to vector<1x2xf32>
    %c0_i32_35 = arith.constant 0 : i32
    %107 = arith.index_cast %105 : i32 to index
    %108 = arith.index_cast %c0_i32_35 : i32 to index
    %109 = memref.load %arg1[%107, %108] : memref<8x8xi32, #tpu.memory_space<smem>>
    %110 = arith.index_cast %109 : i32 to index
    %c0_36 = arith.constant 0 : index
    %111 = vector.load %arg2[%110, %c0_36] : memref<128x2xf32, #tpu.memory_space<vmem>>, vector<1x2xf32>
    %112 = arith.addf %106, %111 : vector<1x2xf32>
    %c1_i32_37 = arith.constant 1 : i32
    %113 = arith.index_cast %105 : i32 to index
    %114 = arith.index_cast %c1_i32_37 : i32 to index
    %115 = memref.load %arg1[%113, %114] : memref<8x8xi32, #tpu.memory_space<smem>>
    %116 = arith.index_cast %115 : i32 to index
    %c0_38 = arith.constant 0 : index
    %117 = vector.load %arg2[%116, %c0_38] : memref<128x2xf32, #tpu.memory_space<vmem>>, vector<1x2xf32>
    %118 = arith.addf %112, %117 : vector<1x2xf32>
    %c2_i32_39 = arith.constant 2 : i32
    %119 = arith.index_cast %105 : i32 to index
    %120 = arith.index_cast %c2_i32_39 : i32 to index
    %121 = memref.load %arg1[%119, %120] : memref<8x8xi32, #tpu.memory_space<smem>>
    %122 = arith.index_cast %121 : i32 to index
    %c0_40 = arith.constant 0 : index
    %123 = vector.load %arg2[%122, %c0_40] : memref<128x2xf32, #tpu.memory_space<vmem>>, vector<1x2xf32>
    %124 = arith.addf %118, %123 : vector<1x2xf32>
    %c3_i32_41 = arith.constant 3 : i32
    %125 = arith.index_cast %105 : i32 to index
    %126 = arith.index_cast %c3_i32_41 : i32 to index
    %127 = memref.load %arg1[%125, %126] : memref<8x8xi32, #tpu.memory_space<smem>>
    %128 = arith.index_cast %127 : i32 to index
    %c0_42 = arith.constant 0 : index
    %129 = vector.load %arg2[%128, %c0_42] : memref<128x2xf32, #tpu.memory_space<vmem>>, vector<1x2xf32>
    %130 = arith.addf %124, %129 : vector<1x2xf32>
    %c4_i32_43 = arith.constant 4 : i32
    %131 = arith.index_cast %105 : i32 to index
    %132 = arith.index_cast %c4_i32_43 : i32 to index
    %133 = memref.load %arg1[%131, %132] : memref<8x8xi32, #tpu.memory_space<smem>>
    %134 = arith.index_cast %133 : i32 to index
    %c0_44 = arith.constant 0 : index
    %135 = vector.load %arg2[%134, %c0_44] : memref<128x2xf32, #tpu.memory_space<vmem>>, vector<1x2xf32>
    %136 = arith.addf %130, %135 : vector<1x2xf32>
    %c5_i32_45 = arith.constant 5 : i32
    %137 = arith.index_cast %105 : i32 to index
    %138 = arith.index_cast %c5_i32_45 : i32 to index
    %139 = memref.load %arg1[%137, %138] : memref<8x8xi32, #tpu.memory_space<smem>>
    %140 = arith.index_cast %139 : i32 to index
    %c0_46 = arith.constant 0 : index
    %141 = vector.load %arg2[%140, %c0_46] : memref<128x2xf32, #tpu.memory_space<vmem>>, vector<1x2xf32>
    %142 = arith.addf %136, %141 : vector<1x2xf32>
    %c6_i32_47 = arith.constant 6 : i32
    %143 = arith.index_cast %105 : i32 to index
    %144 = arith.index_cast %c6_i32_47 : i32 to index
    %145 = memref.load %arg1[%143, %144] : memref<8x8xi32, #tpu.memory_space<smem>>
    %146 = arith.index_cast %145 : i32 to index
    %c0_48 = arith.constant 0 : index
    %147 = vector.load %arg2[%146, %c0_48] : memref<128x2xf32, #tpu.memory_space<vmem>>, vector<1x2xf32>
    %148 = arith.addf %142, %147 : vector<1x2xf32>
    %c7_i32_49 = arith.constant 7 : i32
    %149 = arith.index_cast %105 : i32 to index
    %150 = arith.index_cast %c7_i32_49 : i32 to index
    %151 = memref.load %arg1[%149, %150] : memref<8x8xi32, #tpu.memory_space<smem>>
    %152 = arith.index_cast %151 : i32 to index
    %c0_50 = arith.constant 0 : index
    %153 = vector.load %arg2[%152, %c0_50] : memref<128x2xf32, #tpu.memory_space<vmem>>, vector<1x2xf32>
    %154 = arith.addf %148, %153 : vector<1x2xf32>
    %c8_i32_51 = arith.constant 8 : i32
    %c2 = arith.constant 2 : index
    %c0_52 = arith.constant 0 : index
    %155 = vector.load %arg3[%c2, %c0_52] : memref<8x2xf32, #tpu.memory_space<vmem>>, vector<1x2xf32>
    tpu.vector_store %arg3[%c2, %c0_52], %154 {strides = array<i32>} : memref<8x2xf32, #tpu.memory_space<vmem>>, vector<1x2xf32>,
    %c8_i32_53 = arith.constant 8 : i32
    %156 = arith.muli %arg0, %c8_i32_53 : i32
    %c3_i32_54 = arith.constant 3 : i32
    %157 = arith.addi %156, %c3_i32_54 : i32
    %cst_55 = arith.constant 0.000000e+00 : f32
    %158 = vector.broadcast %cst_55 : f32 to vector<1x2xf32>
    %c0_i32_56 = arith.constant 0 : i32
    %159 = arith.index_cast %157 : i32 to index
    %160 = arith.index_cast %c0_i32_56 : i32 to index
    %161 = memref.load %arg1[%159, %160] : memref<8x8xi32, #tpu.memory_space<smem>>
    %162 = arith.index_cast %161 : i32 to index
    %c0_57 = arith.constant 0 : index
    %163 = vector.load %arg2[%162, %c0_57] : memref<128x2xf32, #tpu.memory_space<vmem>>, vector<1x2xf32>
    %164 = arith.addf %158, %163 : vector<1x2xf32>
    %c1_i32_58 = arith.constant 1 : i32
    %165 = arith.index_cast %157 : i32 to index
    %166 = arith.index_cast %c1_i32_58 : i32 to index
    %167 = memref.load %arg1[%165, %166] : memref<8x8xi32, #tpu.memory_space<smem>>
    %168 = arith.index_cast %167 : i32 to index
    %c0_59 = arith.constant 0 : index
    %169 = vector.load %arg2[%168, %c0_59] : memref<128x2xf32, #tpu.memory_space<vmem>>, vector<1x2xf32>
    %170 = arith.addf %164, %169 : vector<1x2xf32>
    %c2_i32_60 = arith.constant 2 : i32
    %171 = arith.index_cast %157 : i32 to index
    %172 = arith.index_cast %c2_i32_60 : i32 to index
    %173 = memref.load %arg1[%171, %172] : memref<8x8xi32, #tpu.memory_space<smem>>
    %174 = arith.index_cast %173 : i32 to index
    %c0_61 = arith.constant 0 : index
    %175 = vector.load %arg2[%174, %c0_61] : memref<128x2xf32, #tpu.memory_space<vmem>>, vector<1x2xf32>
    %176 = arith.addf %170, %175 : vector<1x2xf32>
    %c3_i32_62 = arith.constant 3 : i32
    %177 = arith.index_cast %157 : i32 to index
    %178 = arith.index_cast %c3_i32_62 : i32 to index
    %179 = memref.load %arg1[%177, %178] : memref<8x8xi32, #tpu.memory_space<smem>>
    %180 = arith.index_cast %179 : i32 to index
    %c0_63 = arith.constant 0 : index
    %181 = vector.load %arg2[%180, %c0_63] : memref<128x2xf32, #tpu.memory_space<vmem>>, vector<1x2xf32>
    %182 = arith.addf %176, %181 : vector<1x2xf32>
    %c4_i32_64 = arith.constant 4 : i32
    %183 = arith.index_cast %157 : i32 to index
    %184 = arith.index_cast %c4_i32_64 : i32 to index
    %185 = memref.load %arg1[%183, %184] : memref<8x8xi32, #tpu.memory_space<smem>>
    %186 = arith.index_cast %185 : i32 to index
    %c0_65 = arith.constant 0 : index
    %187 = vector.load %arg2[%186, %c0_65] : memref<128x2xf32, #tpu.memory_space<vmem>>, vector<1x2xf32>
    %188 = arith.addf %182, %187 : vector<1x2xf32>
    %c5_i32_66 = arith.constant 5 : i32
    %189 = arith.index_cast %157 : i32 to index
    %190 = arith.index_cast %c5_i32_66 : i32 to index
    %191 = memref.load %arg1[%189, %190] : memref<8x8xi32, #tpu.memory_space<smem>>
    %192 = arith.index_cast %191 : i32 to index
    %c0_67 = arith.constant 0 : index
    %193 = vector.load %arg2[%192, %c0_67] : memref<128x2xf32, #tpu.memory_space<vmem>>, vector<1x2xf32>
    %194 = arith.addf %188, %193 : vector<1x2xf32>
    %c6_i32_68 = arith.constant 6 : i32
    %195 = arith.index_cast %157 : i32 to index
    %196 = arith.index_cast %c6_i32_68 : i32 to index
    %197 = memref.load %arg1[%195, %196] : memref<8x8xi32, #tpu.memory_space<smem>>
    %198 = arith.index_cast %197 : i32 to index
    %c0_69 = arith.constant 0 : index
    %199 = vector.load %arg2[%198, %c0_69] : memref<128x2xf32, #tpu.memory_space<vmem>>, vector<1x2xf32>
    %200 = arith.addf %194, %199 : vector<1x2xf32>
    %c7_i32_70 = arith.constant 7 : i32
    %201 = arith.index_cast %157 : i32 to index
    %202 = arith.index_cast %c7_i32_70 : i32 to index
    %203 = memref.load %arg1[%201, %202] : memref<8x8xi32, #tpu.memory_space<smem>>
    %204 = arith.index_cast %203 : i32 to index
    %c0_71 = arith.constant 0 : index
    %205 = vector.load %arg2[%204, %c0_71] : memref<128x2xf32, #tpu.memory_space<vmem>>, vector<1x2xf32>
    %206 = arith.addf %200, %205 : vector<1x2xf32>
    %c8_i32_72 = arith.constant 8 : i32
    %c3 = arith.constant 3 : index
    %c0_73 = arith.constant 0 : index
    %207 = vector.load %arg3[%c3, %c0_73] : memref<8x2xf32, #tpu.memory_space<vmem>>, vector<1x2xf32>
    tpu.vector_store %arg3[%c3, %c0_73], %206 {strides = array<i32>} : memref<8x2xf32, #tpu.memory_space<vmem>>, vector<1x2xf32>,
    %c8_i32_74 = arith.constant 8 : i32
    %208 = arith.muli %arg0, %c8_i32_74 : i32
    %c4_i32_75 = arith.constant 4 : i32
    %209 = arith.addi %208, %c4_i32_75 : i32
    %cst_76 = arith.constant 0.000000e+00 : f32
    %210 = vector.broadcast %cst_76 : f32 to vector<1x2xf32>
    %c0_i32_77 = arith.constant 0 : i32
    %211 = arith.index_cast %209 : i32 to index
    %212 = arith.index_cast %c0_i32_77 : i32 to index
    %213 = memref.load %arg1[%211, %212] : memref<8x8xi32, #tpu.memory_space<smem>>
    %214 = arith.index_cast %213 : i32 to index
    %c0_78 = arith.constant 0 : index
    %215 = vector.load %arg2[%214, %c0_78] : memref<128x2xf32, #tpu.memory_space<vmem>>, vector<1x2xf32>
    %216 = arith.addf %210, %215 : vector<1x2xf32>
    %c1_i32_79 = arith.constant 1 : i32
    %217 = arith.index_cast %209 : i32 to index
    %218 = arith.index_cast %c1_i32_79 : i32 to index
    %219 = memref.load %arg1[%217, %218] : memref<8x8xi32, #tpu.memory_space<smem>>
    %220 = arith.index_cast %219 : i32 to index
    %c0_80 = arith.constant 0 : index
    %221 = vector.load %arg2[%220, %c0_80] : memref<128x2xf32, #tpu.memory_space<vmem>>, vector<1x2xf32>
    %222 = arith.addf %216, %221 : vector<1x2xf32>
    %c2_i32_81 = arith.constant 2 : i32
    %223 = arith.index_cast %209 : i32 to index
    %224 = arith.index_cast %c2_i32_81 : i32 to index
    %225 = memref.load %arg1[%223, %224] : memref<8x8xi32, #tpu.memory_space<smem>>
    %226 = arith.index_cast %225 : i32 to index
    %c0_82 = arith.constant 0 : index
    %227 = vector.load %arg2[%226, %c0_82] : memref<128x2xf32, #tpu.memory_space<vmem>>, vector<1x2xf32>
    %228 = arith.addf %222, %227 : vector<1x2xf32>
    %c3_i32_83 = arith.constant 3 : i32
    %229 = arith.index_cast %209 : i32 to index
    %230 = arith.index_cast %c3_i32_83 : i32 to index
    %231 = memref.load %arg1[%229, %230] : memref<8x8xi32, #tpu.memory_space<smem>>
    %232 = arith.index_cast %231 : i32 to index
    %c0_84 = arith.constant 0 : index
    %233 = vector.load %arg2[%232, %c0_84] : memref<128x2xf32, #tpu.memory_space<vmem>>, vector<1x2xf32>
    %234 = arith.addf %228, %233 : vector<1x2xf32>
    %c4_i32_85 = arith.constant 4 : i32
    %235 = arith.index_cast %209 : i32 to index
    %236 = arith.index_cast %c4_i32_85 : i32 to index
    %237 = memref.load %arg1[%235, %236] : memref<8x8xi32, #tpu.memory_space<smem>>
    %238 = arith.index_cast %237 : i32 to index
    %c0_86 = arith.constant 0 : index
    %239 = vector.load %arg2[%238, %c0_86] : memref<128x2xf32, #tpu.memory_space<vmem>>, vector<1x2xf32>
    %240 = arith.addf %234, %239 : vector<1x2xf32>
    %c5_i32_87 = arith.constant 5 : i32
    %241 = arith.index_cast %209 : i32 to index
    %242 = arith.index_cast %c5_i32_87 : i32 to index
    %243 = memref.load %arg1[%241, %242] : memref<8x8xi32, #tpu.memory_space<smem>>
    %244 = arith.index_cast %243 : i32 to index
    %c0_88 = arith.constant 0 : index
    %245 = vector.load %arg2[%244, %c0_88] : memref<128x2xf32, #tpu.memory_space<vmem>>, vector<1x2xf32>
    %246 = arith.addf %240, %245 : vector<1x2xf32>
    %c6_i32_89 = arith.constant 6 : i32
    %247 = arith.index_cast %209 : i32 to index
    %248 = arith.index_cast %c6_i32_89 : i32 to index
    %249 = memref.load %arg1[%247, %248] : memref<8x8xi32, #tpu.memory_space<smem>>
    %250 = arith.index_cast %249 : i32 to index
    %c0_90 = arith.constant 0 : index
    %251 = vector.load %arg2[%250, %c0_90] : memref<128x2xf32, #tpu.memory_space<vmem>>, vector<1x2xf32>
    %252 = arith.addf %246, %251 : vector<1x2xf32>
    %c7_i32_91 = arith.constant 7 : i32
    %253 = arith.index_cast %209 : i32 to index
    %254 = arith.index_cast %c7_i32_91 : i32 to index
    %255 = memref.load %arg1[%253, %254] : memref<8x8xi32, #tpu.memory_space<smem>>
    %256 = arith.index_cast %255 : i32 to index
    %c0_92 = arith.constant 0 : index
    %257 = vector.load %arg2[%256, %c0_92] : memref<128x2xf32, #tpu.memory_space<vmem>>, vector<1x2xf32>
    %258 = arith.addf %252, %257 : vector<1x2xf32>
    %c8_i32_93 = arith.constant 8 : i32
    %c4 = arith.constant 4 : index
    %c0_94 = arith.constant 0 : index
    %259 = vector.load %arg3[%c4, %c0_94] : memref<8x2xf32, #tpu.memory_space<vmem>>, vector<1x2xf32>
    tpu.vector_store %arg3[%c4, %c0_94], %258 {strides = array<i32>} : memref<8x2xf32, #tpu.memory_space<vmem>>, vector<1x2xf32>,
    %c8_i32_95 = arith.constant 8 : i32
    %260 = arith.muli %arg0, %c8_i32_95 : i32
    %c5_i32_96 = arith.constant 5 : i32
    %261 = arith.addi %260, %c5_i32_96 : i32
    %cst_97 = arith.constant 0.000000e+00 : f32
    %262 = vector.broadcast %cst_97 : f32 to vector<1x2xf32>
    %c0_i32_98 = arith.constant 0 : i32
    %263 = arith.index_cast %261 : i32 to index
    %264 = arith.index_cast %c0_i32_98 : i32 to index
    %265 = memref.load %arg1[%263, %264] : memref<8x8xi32, #tpu.memory_space<smem>>
    %266 = arith.index_cast %265 : i32 to index
    %c0_99 = arith.constant 0 : index
    %267 = vector.load %arg2[%266, %c0_99] : memref<128x2xf32, #tpu.memory_space<vmem>>, vector<1x2xf32>
    %268 = arith.addf %262, %267 : vector<1x2xf32>
    %c1_i32_100 = arith.constant 1 : i32
    %269 = arith.index_cast %261 : i32 to index
    %270 = arith.index_cast %c1_i32_100 : i32 to index
    %271 = memref.load %arg1[%269, %270] : memref<8x8xi32, #tpu.memory_space<smem>>
    %272 = arith.index_cast %271 : i32 to index
    %c0_101 = arith.constant 0 : index
    %273 = vector.load %arg2[%272, %c0_101] : memref<128x2xf32, #tpu.memory_space<vmem>>, vector<1x2xf32>
    %274 = arith.addf %268, %273 : vector<1x2xf32>
    %c2_i32_102 = arith.constant 2 : i32
    %275 = arith.index_cast %261 : i32 to index
    %276 = arith.index_cast %c2_i32_102 : i32 to index
    %277 = memref.load %arg1[%275, %276] : memref<8x8xi32, #tpu.memory_space<smem>>
    %278 = arith.index_cast %277 : i32 to index
    %c0_103 = arith.constant 0 : index
    %279 = vector.load %arg2[%278, %c0_103] : memref<128x2xf32, #tpu.memory_space<vmem>>, vector<1x2xf32>
    %280 = arith.addf %274, %279 : vector<1x2xf32>
    %c3_i32_104 = arith.constant 3 : i32
    %281 = arith.index_cast %261 : i32 to index
    %282 = arith.index_cast %c3_i32_104 : i32 to index
    %283 = memref.load %arg1[%281, %282] : memref<8x8xi32, #tpu.memory_space<smem>>
    %284 = arith.index_cast %283 : i32 to index
    %c0_105 = arith.constant 0 : index
    %285 = vector.load %arg2[%284, %c0_105] : memref<128x2xf32, #tpu.memory_space<vmem>>, vector<1x2xf32>
    %286 = arith.addf %280, %285 : vector<1x2xf32>
    %c4_i32_106 = arith.constant 4 : i32
    %287 = arith.index_cast %261 : i32 to index
    %288 = arith.index_cast %c4_i32_106 : i32 to index
    %289 = memref.load %arg1[%287, %288] : memref<8x8xi32, #tpu.memory_space<smem>>
    %290 = arith.index_cast %289 : i32 to index
    %c0_107 = arith.constant 0 : index
    %291 = vector.load %arg2[%290, %c0_107] : memref<128x2xf32, #tpu.memory_space<vmem>>, vector<1x2xf32>
    %292 = arith.addf %286, %291 : vector<1x2xf32>
    %c5_i32_108 = arith.constant 5 : i32
    %293 = arith.index_cast %261 : i32 to index
    %294 = arith.index_cast %c5_i32_108 : i32 to index
    %295 = memref.load %arg1[%293, %294] : memref<8x8xi32, #tpu.memory_space<smem>>
    %296 = arith.index_cast %295 : i32 to index
    %c0_109 = arith.constant 0 : index
    %297 = vector.load %arg2[%296, %c0_109] : memref<128x2xf32, #tpu.memory_space<vmem>>, vector<1x2xf32>
    %298 = arith.addf %292, %297 : vector<1x2xf32>
    %c6_i32_110 = arith.constant 6 : i32
    %299 = arith.index_cast %261 : i32 to index
    %300 = arith.index_cast %c6_i32_110 : i32 to index
    %301 = memref.load %arg1[%299, %300] : memref<8x8xi32, #tpu.memory_space<smem>>
    %302 = arith.index_cast %301 : i32 to index
    %c0_111 = arith.constant 0 : index
    %303 = vector.load %arg2[%302, %c0_111] : memref<128x2xf32, #tpu.memory_space<vmem>>, vector<1x2xf32>
    %304 = arith.addf %298, %303 : vector<1x2xf32>
    %c7_i32_112 = arith.constant 7 : i32
    %305 = arith.index_cast %261 : i32 to index
    %306 = arith.index_cast %c7_i32_112 : i32 to index
    %307 = memref.load %arg1[%305, %306] : memref<8x8xi32, #tpu.memory_space<smem>>
    %308 = arith.index_cast %307 : i32 to index
    %c0_113 = arith.constant 0 : index
    %309 = vector.load %arg2[%308, %c0_113] : memref<128x2xf32, #tpu.memory_space<vmem>>, vector<1x2xf32>
    %310 = arith.addf %304, %309 : vector<1x2xf32>
    %c8_i32_114 = arith.constant 8 : i32
    %c5 = arith.constant 5 : index
    %c0_115 = arith.constant 0 : index
    %311 = vector.load %arg3[%c5, %c0_115] : memref<8x2xf32, #tpu.memory_space<vmem>>, vector<1x2xf32>
    tpu.vector_store %arg3[%c5, %c0_115], %310 {strides = array<i32>} : memref<8x2xf32, #tpu.memory_space<vmem>>, vector<1x2xf32>,
    %c8_i32_116 = arith.constant 8 : i32
    %312 = arith.muli %arg0, %c8_i32_116 : i32
    %c6_i32_117 = arith.constant 6 : i32
    %313 = arith.addi %312, %c6_i32_117 : i32
    %cst_118 = arith.constant 0.000000e+00 : f32
    %314 = vector.broadcast %cst_118 : f32 to vector<1x2xf32>
    %c0_i32_119 = arith.constant 0 : i32
    %315 = arith.index_cast %313 : i32 to index
    %316 = arith.index_cast %c0_i32_119 : i32 to index
    %317 = memref.load %arg1[%315, %316] : memref<8x8xi32, #tpu.memory_space<smem>>
    %318 = arith.index_cast %317 : i32 to index
    %c0_120 = arith.constant 0 : index
    %319 = vector.load %arg2[%318, %c0_120] : memref<128x2xf32, #tpu.memory_space<vmem>>, vector<1x2xf32>
    %320 = arith.addf %314, %319 : vector<1x2xf32>
    %c1_i32_121 = arith.constant 1 : i32
    %321 = arith.index_cast %313 : i32 to index
    %322 = arith.index_cast %c1_i32_121 : i32 to index
    %323 = memref.load %arg1[%321, %322] : memref<8x8xi32, #tpu.memory_space<smem>>
    %324 = arith.index_cast %323 : i32 to index
    %c0_122 = arith.constant 0 : index
    %325 = vector.load %arg2[%324, %c0_122] : memref<128x2xf32, #tpu.memory_space<vmem>>, vector<1x2xf32>
    %326 = arith.addf %320, %325 : vector<1x2xf32>
    %c2_i32_123 = arith.constant 2 : i32
    %327 = arith.index_cast %313 : i32 to index
    %328 = arith.index_cast %c2_i32_123 : i32 to index
    %329 = memref.load %arg1[%327, %328] : memref<8x8xi32, #tpu.memory_space<smem>>
    %330 = arith.index_cast %329 : i32 to index
    %c0_124 = arith.constant 0 : index
    %331 = vector.load %arg2[%330, %c0_124] : memref<128x2xf32, #tpu.memory_space<vmem>>, vector<1x2xf32>
    %332 = arith.addf %326, %331 : vector<1x2xf32>
    %c3_i32_125 = arith.constant 3 : i32
    %333 = arith.index_cast %313 : i32 to index
    %334 = arith.index_cast %c3_i32_125 : i32 to index
    %335 = memref.load %arg1[%333, %334] : memref<8x8xi32, #tpu.memory_space<smem>>
    %336 = arith.index_cast %335 : i32 to index
    %c0_126 = arith.constant 0 : index
    %337 = vector.load %arg2[%336, %c0_126] : memref<128x2xf32, #tpu.memory_space<vmem>>, vector<1x2xf32>
    %338 = arith.addf %332, %337 : vector<1x2xf32>
    %c4_i32_127 = arith.constant 4 : i32
    %339 = arith.index_cast %313 : i32 to index
    %340 = arith.index_cast %c4_i32_127 : i32 to index
    %341 = memref.load %arg1[%339, %340] : memref<8x8xi32, #tpu.memory_space<smem>>
    %342 = arith.index_cast %341 : i32 to index
    %c0_128 = arith.constant 0 : index
    %343 = vector.load %arg2[%342, %c0_128] : memref<128x2xf32, #tpu.memory_space<vmem>>, vector<1x2xf32>
    %344 = arith.addf %338, %343 : vector<1x2xf32>
    %c5_i32_129 = arith.constant 5 : i32
    %345 = arith.index_cast %313 : i32 to index
    %346 = arith.index_cast %c5_i32_129 : i32 to index
    %347 = memref.load %arg1[%345, %346] : memref<8x8xi32, #tpu.memory_space<smem>>
    %348 = arith.index_cast %347 : i32 to index
    %c0_130 = arith.constant 0 : index
    %349 = vector.load %arg2[%348, %c0_130] : memref<128x2xf32, #tpu.memory_space<vmem>>, vector<1x2xf32>
    %350 = arith.addf %344, %349 : vector<1x2xf32>
    %c6_i32_131 = arith.constant 6 : i32
    %351 = arith.index_cast %313 : i32 to index
    %352 = arith.index_cast %c6_i32_131 : i32 to index
    %353 = memref.load %arg1[%351, %352] : memref<8x8xi32, #tpu.memory_space<smem>>
    %354 = arith.index_cast %353 : i32 to index
    %c0_132 = arith.constant 0 : index
    %355 = vector.load %arg2[%354, %c0_132] : memref<128x2xf32, #tpu.memory_space<vmem>>, vector<1x2xf32>
    %356 = arith.addf %350, %355 : vector<1x2xf32>
    %c7_i32_133 = arith.constant 7 : i32
    %357 = arith.index_cast %313 : i32 to index
    %358 = arith.index_cast %c7_i32_133 : i32 to index
    %359 = memref.load %arg1[%357, %358] : memref<8x8xi32, #tpu.memory_space<smem>>
    %360 = arith.index_cast %359 : i32 to index
    %c0_134 = arith.constant 0 : index
    %361 = vector.load %arg2[%360, %c0_134] : memref<128x2xf32, #tpu.memory_space<vmem>>, vector<1x2xf32>
    %362 = arith.addf %356, %361 : vector<1x2xf32>
    %c8_i32_135 = arith.constant 8 : i32
    %c6 = arith.constant 6 : index
    %c0_136 = arith.constant 0 : index
    %363 = vector.load %arg3[%c6, %c0_136] : memref<8x2xf32, #tpu.memory_space<vmem>>, vector<1x2xf32>
    tpu.vector_store %arg3[%c6, %c0_136], %362 {strides = array<i32>} : memref<8x2xf32, #tpu.memory_space<vmem>>, vector<1x2xf32>,
    %c8_i32_137 = arith.constant 8 : i32
    %364 = arith.muli %arg0, %c8_i32_137 : i32
    %c7_i32_138 = arith.constant 7 : i32
    %365 = arith.addi %364, %c7_i32_138 : i32
    %cst_139 = arith.constant 0.000000e+00 : f32
    %366 = vector.broadcast %cst_139 : f32 to vector<1x2xf32>
    %c0_i32_140 = arith.constant 0 : i32
    %367 = arith.index_cast %365 : i32 to index
    %368 = arith.index_cast %c0_i32_140 : i32 to index
    %369 = memref.load %arg1[%367, %368] : memref<8x8xi32, #tpu.memory_space<smem>>
    %370 = arith.index_cast %369 : i32 to index
    %c0_141 = arith.constant 0 : index
    %371 = vector.load %arg2[%370, %c0_141] : memref<128x2xf32, #tpu.memory_space<vmem>>, vector<1x2xf32>
    %372 = arith.addf %366, %371 : vector<1x2xf32>
    %c1_i32_142 = arith.constant 1 : i32
    %373 = arith.index_cast %365 : i32 to index
    %374 = arith.index_cast %c1_i32_142 : i32 to index
    %375 = memref.load %arg1[%373, %374] : memref<8x8xi32, #tpu.memory_space<smem>>
    %376 = arith.index_cast %375 : i32 to index
    %c0_143 = arith.constant 0 : index
    %377 = vector.load %arg2[%376, %c0_143] : memref<128x2xf32, #tpu.memory_space<vmem>>, vector<1x2xf32>
    %378 = arith.addf %372, %377 : vector<1x2xf32>
    %c2_i32_144 = arith.constant 2 : i32
    %379 = arith.index_cast %365 : i32 to index
    %380 = arith.index_cast %c2_i32_144 : i32 to index
    %381 = memref.load %arg1[%379, %380] : memref<8x8xi32, #tpu.memory_space<smem>>
    %382 = arith.index_cast %381 : i32 to index
    %c0_145 = arith.constant 0 : index
    %383 = vector.load %arg2[%382, %c0_145] : memref<128x2xf32, #tpu.memory_space<vmem>>, vector<1x2xf32>
    %384 = arith.addf %378, %383 : vector<1x2xf32>
    %c3_i32_146 = arith.constant 3 : i32
    %385 = arith.index_cast %365 : i32 to index
    %386 = arith.index_cast %c3_i32_146 : i32 to index
    %387 = memref.load %arg1[%385, %386] : memref<8x8xi32, #tpu.memory_space<smem>>
    %388 = arith.index_cast %387 : i32 to index
    %c0_147 = arith.constant 0 : index
    %389 = vector.load %arg2[%388, %c0_147] : memref<128x2xf32, #tpu.memory_space<vmem>>, vector<1x2xf32>
    %390 = arith.addf %384, %389 : vector<1x2xf32>
    %c4_i32_148 = arith.constant 4 : i32
    %391 = arith.index_cast %365 : i32 to index
    %392 = arith.index_cast %c4_i32_148 : i32 to index
    %393 = memref.load %arg1[%391, %392] : memref<8x8xi32, #tpu.memory_space<smem>>
    %394 = arith.index_cast %393 : i32 to index
    %c0_149 = arith.constant 0 : index
    %395 = vector.load %arg2[%394, %c0_149] : memref<128x2xf32, #tpu.memory_space<vmem>>, vector<1x2xf32>
    %396 = arith.addf %390, %395 : vector<1x2xf32>
    %c5_i32_150 = arith.constant 5 : i32
    %397 = arith.index_cast %365 : i32 to index
    %398 = arith.index_cast %c5_i32_150 : i32 to index
    %399 = memref.load %arg1[%397, %398] : memref<8x8xi32, #tpu.memory_space<smem>>
    %400 = arith.index_cast %399 : i32 to index
    %c0_151 = arith.constant 0 : index
    %401 = vector.load %arg2[%400, %c0_151] : memref<128x2xf32, #tpu.memory_space<vmem>>, vector<1x2xf32>
    %402 = arith.addf %396, %401 : vector<1x2xf32>
    %c6_i32_152 = arith.constant 6 : i32
    %403 = arith.index_cast %365 : i32 to index
    %404 = arith.index_cast %c6_i32_152 : i32 to index
    %405 = memref.load %arg1[%403, %404] : memref<8x8xi32, #tpu.memory_space<smem>>
    %406 = arith.index_cast %405 : i32 to index
    %c0_153 = arith.constant 0 : index
    %407 = vector.load %arg2[%406, %c0_153] : memref<128x2xf32, #tpu.memory_space<vmem>>, vector<1x2xf32>
    %408 = arith.addf %402, %407 : vector<1x2xf32>
    %c7_i32_154 = arith.constant 7 : i32
    %409 = arith.index_cast %365 : i32 to index
    %410 = arith.index_cast %c7_i32_154 : i32 to index
    %411 = memref.load %arg1[%409, %410] : memref<8x8xi32, #tpu.memory_space<smem>>
    %412 = arith.index_cast %411 : i32 to index
    %c0_155 = arith.constant 0 : index
    %413 = vector.load %arg2[%412, %c0_155] : memref<128x2xf32, #tpu.memory_space<vmem>>, vector<1x2xf32>
    %414 = arith.addf %408, %413 : vector<1x2xf32>
    %c8_i32_156 = arith.constant 8 : i32
    %c7 = arith.constant 7 : index
    %c0_157 = arith.constant 0 : index
    %415 = vector.load %arg3[%c7, %c0_157] : memref<8x2xf32, #tpu.memory_space<vmem>>, vector<1x2xf32>
    tpu.vector_store %arg3[%c7, %c0_157], %414 {strides = array<i32>} : memref<8x2xf32, #tpu.memory_space<vmem>>, vector<1x2xf32>,
    return
  }
  func.func @transform_0(%arg0: i32, %arg1: memref<8x8xi32, #tpu.memory_space<smem>>) -> (i32, i32) {
    %c0_i32 = arith.constant 0 : i32
    %c0_i32_0 = arith.constant 0 : i32
    %c0_i32_1 = arith.constant 0 : i32
    return %c0_i32, %c0_i32_0 : i32, i32
  }
  func.func @transform_1(%arg0: i32, %arg1: memref<8x8xi32, #tpu.memory_space<smem>>) -> (i32, i32) {
    %c0_i32 = arith.constant 0 : i32
    %c0_i32_0 = arith.constant 0 : i32
    return %arg0, %c0_i32 : i32, i32
  }
}

</mosaic_0001>

<bundles_post_ra>
// kernel: cbow_logreg_forward.1
= control target key start
LH: loop header
LB: loop body
LE: loop exit
PB: predicated region body
PF: predicated region fallthrough
CT: control target
= control target key end

     0   :  { %s819_s0 = inlined_call_operand.vmem [shape: s32[8,8], index: 0, kind: input, shape index: {}]   ;;  %s820_s1 = inlined_call_operand.vmem [shape: f32[128,2], index: 1, kind: input, shape index: {}]   ;;  %s821_s2 = inlined_call_operand.vmem [shape: f32[8,2], index: 2, kind: output, shape index: {}]  }
   0x1   :  { %s7_s11 = sshll.u32 %s819_s0, 4  ;;  %s8_s11 = int_to_ptr.vmem [resolvable:$true] %s7_s11 }
   0x2   :  { %s484_s12 = scalar_lea.vmem %s8_s11, 128  ;;  %p489_p1 = scmp.lt.s32.totalorder %s8_s11, %s8_s11 }
   0x3   :  { %p485_p0 = scmp.ne.s32.totalorder %s8_s11, %s484_s12  ;;  %p490_p2 = scmp.lt.s32.totalorder %s484_s12, %s484_s12 }
   0x5   :  { %p491_p3 = por %p490_p2, %p489_p1 }
   0x7   :  { %p492_p4 = pnand %p491_p3, %p485_p0 }
   0x9   :  { %495 = shalt.err (!%p492_p4)  }
   0xa   :  { %s498_s13 = smov [#allocation3]  }
   0xb   :  { %10 = dma.vmem_to_smem %s8_s11, 128, %s498_s13, [#allocation2] }
   0xc   :  { %496 = dma.done.wait [#allocation2], 128 }
   0xd   :  { %497 = vsyncadd [#allocation2], 4294967168 }
   0xe   :  { %12 = sfence }
   0xf   :  { %s17_s14 = sld [smem:[#allocation3]]  ;;  %vm56_vm0 = vcmask 8192  }
  0x10   :  { %s420_s15 = sld [smem:[#allocation3 + $0x1]] }
  0x11   :  { %s421_s16 = sld [smem:[#allocation3 + $0x2]] }
  0x12   :  { %s422_s17 = sld [smem:[#allocation3 + $0x3]] }
  0x13   :  { %s423_s18 = sld [smem:[#allocation3 + $0x4]] }
  0x14   :  { %s424_s19 = sld [smem:[#allocation3 + $0x5]] }
  0x15   :  { %s18_s21 = scalar_lea.vmem %s820_s1, %s17_s14  ;;  %s520_s22 = sld [smem:[#allocation3 + $0x6]] }
  0x16   :  { %v19_v0 = vld [vmem:[%s18_s21] sm:$0x1]  ;;  %s23_s25 = scalar_lea.vmem %s820_s1, %s420_s15  ;;  %s525_s26 = sld [smem:[#allocation3 + $0x7]] }
  0x17   :  { %v24_v1 = vld [vmem:[%s23_s25] sm:$0x1]  ;;  %s28_s29 = scalar_lea.vmem %s820_s1, %s421_s16  ;;  %s427_s30 = sld [smem:[#allocation3 + $0x80]] }
  0x18   :  { %v25_v2 = vadd.f32 %v24_v1, %v19_v0  ;;  %v29_v3 = vld [vmem:[%s28_s29] sm:$0x1]  ;;  %s33_s5 = scalar_lea.vmem %s820_s1, %s422_s17  ;;  %s428_s6 = sld [smem:[#allocation3 + $0x81]] }
  0x19   :  { %v34_v4 = vld [vmem:[%s33_s5] sm:$0x1]  ;;  %s38_s9 = scalar_lea.vmem %s820_s1, %s423_s18  ;;  %s429_s10 = sld [smem:[#allocation3 + $0x82]] }
  0x1a   :  { %v30_v5 = vadd.f32 %v29_v3, %v25_v2  ;;  %s43_s13 = scalar_lea.vmem %s820_s1, %s424_s19  ;;  %s430_s14 = sld [smem:[#allocation3 + $0x83]]  ;;  %v39_v6 = vld [vmem:[%s38_s9] sm:$0x1] }
  0x1b   :  { %s48_s0 = scalar_lea.vmem %s820_s1, %s520_s22  ;;  %s543_s20 = sld [smem:[#allocation3 + $0x84]]  ;;  %v44_v8 = vld [vmem:[%s43_s13] sm:$0x1] }
  0x1c   :  { %v35_v7 = vadd.f32 %v34_v4, %v30_v5  ;;  %s53_s23 = scalar_lea.vmem %s820_s1, %s525_s26  ;;  %s549_s18 = sld [smem:[#allocation3 + $0x85]]  ;;  %v49_v11 = vld [vmem:[%s48_s0] sm:$0x1] }
  0x1d   :  { %s61_s19 = scalar_lea.vmem %s820_s1, %s427_s30  ;;  %s554_s27 = sld [smem:[#allocation3 + $0x86]]  ;;  %v54_v16 = vld [vmem:[%s53_s23] sm:$0x1] }
  0x1e   :  { %v40_v9 = vadd.f32 %v39_v6, %v35_v7  ;;  %v62_v10 = vld [vmem:[%s61_s19] sm:$0x1]  ;;  %s66_s29 = scalar_lea.vmem %s820_s1, %s428_s6  ;;  %s559_s3 = sld [smem:[#allocation3 + $0x87]] }
  0x1f   :  { %v67_v12 = vld [vmem:[%s66_s29] sm:$0x1]  ;;  %s71_s5 = scalar_lea.vmem %s820_s1, %s429_s10  ;;  %s435_s7 = sld [smem:[#allocation3 + $0x100]] }
  0x20   :  { %v45_v13 = vadd.f32 %v44_v8, %v40_v9  ;;  %v68_v14 = vadd.f32 %v67_v12, %v62_v10  ;;  %v72_v15 = vld [vmem:[%s71_s5] sm:$0x1]  ;;  %s76_s9 = scalar_lea.vmem %s820_s1, %s430_s14  ;;  %s436_s6 = sld [smem:[#allocation3 + $0x101]] }
  0x21   :  { %v77_v17 = vld [vmem:[%s76_s9] sm:$0x1]  ;;  %s81_s13 = scalar_lea.vmem %s820_s1, %s543_s20  ;;  %s437_s15 = sld [smem:[#allocation3 + $0x102]] }
  0x22   :  { %v50_v18 = vadd.f32 %v49_v11, %v45_v13  ;;  %v73_v19 = vadd.f32 %v72_v15, %v68_v14  ;;  %s86_s0 = scalar_lea.vmem %s820_s1, %s549_s18  ;;  %s438_s17 = sld [smem:[#allocation3 + $0x103]]  ;;  %v82_v20 = vld [vmem:[%s81_s13] sm:$0x1] }
  0x23   :  { %s91_s24 = scalar_lea.vmem %s820_s1, %s554_s27  ;;  %s579_s23 = sld [smem:[#allocation3 + $0x104]]  ;;  %v87_v23 = vld [vmem:[%s86_s0] sm:$0x1] }
  0x24   :  { %v55_v21 = vadd.f32 %v54_v16, %v50_v18  ;;  %v78_v22 = vadd.f32 %v77_v17, %v73_v19  ;;  %s96_s19 = scalar_lea.vmem %s820_s1, %s559_s3  ;;  %s585_s22 = sld [smem:[#allocation3 + $0x105]]  ;;  %v92_v26 = vld [vmem:[%s91_s24] sm:$0x1] }
  0x25   :  { %s103_s29 = scalar_lea.vmem %s820_s1, %s435_s7  ;;  %s590_s26 = sld [smem:[#allocation3 + $0x106]]  ;;  %v97_v31 = vld [vmem:[%s96_s19] sm:$0x1] }
  0x26   :  { %57 = vst.msk [vmem:[%s821_s2] sm:$0x1] %vm56_vm0, %v55_v21  ;;  %v83_v24 = vadd.f32 %v82_v20, %v78_v22  ;;  %v104_v25 = vld [vmem:[%s103_s29] sm:$0x1]  ;;  %s108_s3 = scalar_lea.vmem %s820_s1, %s436_s6  ;;  %s599_s8 = sld [smem:[#allocation3 + $0x107]] }
  0x27   :  { %v109_v27 = vld [vmem:[%s108_s3] sm:$0x1]  ;;  %s113_s11 = scalar_lea.vmem %s820_s1, %s437_s15  ;;  %s443_s12 = sld [smem:[#allocation3 + $0x180]] }
  0x28   :  { %v88_v28 = vadd.f32 %v87_v23, %v83_v24  ;;  %v110_v29 = vadd.f32 %v109_v27, %v104_v25  ;;  %v114_v30 = vld [vmem:[%s113_s11] sm:$0x1]  ;;  %s118_s16 = scalar_lea.vmem %s820_s1, %s438_s17  ;;  %s444_s6 = sld [smem:[#allocation3 + $0x181]] }
  0x29   :  { %v119_v32 = vld [vmem:[%s118_s16] sm:$0x1]  ;;  %s123_s14 = scalar_lea.vmem %s820_s1, %s579_s23  ;;  %s445_s24 = sld [smem:[#allocation3 + $0x182]] }
  0x2a   :  { %v93_v33 = vadd.f32 %v92_v26, %v88_v28  ;;  %v115_v34 = vadd.f32 %v114_v30, %v110_v29  ;;  %s128_s20 = scalar_lea.vmem %s820_s1, %s585_s22  ;;  %s446_s28 = sld [smem:[#allocation3 + $0x183]]  ;;  %v124_v35 = vld [vmem:[%s123_s14] sm:$0x1] }
  0x2b   :  { %s133_s17 = scalar_lea.vmem %s820_s1, %s590_s26  ;;  %s619_s4 = sld [smem:[#allocation3 + $0x184]]  ;;  %v129_v38 = vld [vmem:[%s128_s20] sm:$0x1] }
  0x2c   :  { %v98_v36 = vadd.f32 %v97_v31, %v93_v33  ;;  %v120_v37 = vadd.f32 %v119_v32, %v115_v34  ;;  %s138_s23 = scalar_lea.vmem %s820_s1, %s599_s8  ;;  %s625_s5 = sld [smem:[#allocation3 + $0x185]]  ;;  %v134_v41 = vld [vmem:[%s133_s17] sm:$0x1] }
  0x2d   :  { %s145_s22 = scalar_lea.vmem %s820_s1, %s443_s12  ;;  %s630_s7 = sld [smem:[#allocation3 + $0x186]]  ;;  %v139_v46 = vld [vmem:[%s138_s23] sm:$0x1] }
  0x2e   :  { %99 = vst.msk [vmem:[%s821_s2 + $0x1] sm:$0x1] %vm56_vm0, %v98_v36  ;;  %v125_v39 = vadd.f32 %v124_v35, %v120_v37  ;;  %v146_v40 = vld [vmem:[%s145_s22] sm:$0x1]  ;;  %s150_s8 = scalar_lea.vmem %s820_s1, %s444_s6  ;;  %s639_s10 = sld [smem:[#allocation3 + $0x187]] }
  0x2f   :  { %v151_v42 = vld [vmem:[%s150_s8] sm:$0x1]  ;;  %s155_s0 = scalar_lea.vmem %s820_s1, %s445_s24  ;;  %s451_s21 = sld [smem:[#allocation3 + $0x200]] }
  0x30   :  { %v130_v43 = vadd.f32 %v129_v38, %v125_v39  ;;  %v152_v44 = vadd.f32 %v151_v42, %v146_v40  ;;  %v156_v45 = vld [vmem:[%s155_s0] sm:$0x1]  ;;  %s160_s25 = scalar_lea.vmem %s820_s1, %s446_s28  ;;  %s452_s6 = sld [smem:[#allocation3 + $0x201]] }
  0x31   :  { %v161_v47 = vld [vmem:[%s160_s25] sm:$0x1]  ;;  %s165_s29 = scalar_lea.vmem %s820_s1, %s619_s4  ;;  %s453_s17 = sld [smem:[#allocation3 + $0x202]] }
  0x32   :  { %v135_v48 = vadd.f32 %v134_v41, %v130_v43  ;;  %v157_v49 = vadd.f32 %v156_v45, %v152_v44  ;;  %s170_s27 = scalar_lea.vmem %s820_s1, %s625_s5  ;;  %s454_s30 = sld [smem:[#allocation3 + $0x203]]  ;;  %v166_v50 = vld [vmem:[%s165_s29] sm:$0x1] }
  0x33   :  { %s175_s28 = scalar_lea.vmem %s820_s1, %s630_s7  ;;  %s659_s9 = sld [smem:[#allocation3 + $0x204]]  ;;  %v171_v53 = vld [vmem:[%s170_s27] sm:$0x1] }
  0x34   :  { %v140_v51 = vadd.f32 %v139_v46, %v135_v48  ;;  %v162_v52 = vadd.f32 %v161_v47, %v157_v49  ;;  %s180_s4 = scalar_lea.vmem %s820_s1, %s639_s10  ;;  %s665_s11 = sld [smem:[#allocation3 + $0x205]]  ;;  %v176_v56 = vld [vmem:[%s175_s28] sm:$0x1] }
  0x35   :  { %s187_s5 = scalar_lea.vmem %s820_s1, %s451_s21  ;;  %s670_s12 = sld [smem:[#allocation3 + $0x206]]  ;;  %v181_v61 = vld [vmem:[%s180_s4] sm:$0x1] }
  0x36   :  { %141 = vst.msk [vmem:[%s821_s2 + $0x2] sm:$0x1] %vm56_vm0, %v140_v51  ;;  %v167_v54 = vadd.f32 %v166_v50, %v162_v52  ;;  %v188_v55 = vld [vmem:[%s187_s5] sm:$0x1]  ;;  %s192_s10 = scalar_lea.vmem %s820_s1, %s452_s6  ;;  %s679_s15 = sld [smem:[#allocation3 + $0x207]] }
  0x37   :  { %v193_v57 = vld [vmem:[%s192_s10] sm:$0x1]  ;;  %s197_s20 = scalar_lea.vmem %s820_s1, %s453_s17  ;;  %s459_s18 = sld [smem:[#allocation3 + $0x280]] }
  0x38   :  { %v172_v58 = vadd.f32 %v171_v53, %v167_v54  ;;  %v194_v59 = vadd.f32 %v193_v57, %v188_v55  ;;  %v198_v60 = vld [vmem:[%s197_s20] sm:$0x1]  ;;  %s202_s19 = scalar_lea.vmem %s820_s1, %s454_s30  ;;  %s460_s6 = sld [smem:[#allocation3 + $0x281]] }
  0x39   :  { %v203_v62 = vld [vmem:[%s202_s19] sm:$0x1]  ;;  %s207_s22 = scalar_lea.vmem %s820_s1, %s659_s9  ;;  %s461_s28 = sld [smem:[#allocation3 + $0x282]] }
  0x3a   :  { %v177_v63 = vadd.f32 %v176_v56, %v172_v58  ;;  %v199_v0 = vadd.f32 %v198_v60, %v194_v59  ;;  %s212_s26 = scalar_lea.vmem %s820_s1, %s665_s11  ;;  %s462_s13 = sld [smem:[#allocation3 + $0x283]]  ;;  %v208_v1 = vld [vmem:[%s207_s22] sm:$0x1] }
  0x3b   :  { %s217_s30 = scalar_lea.vmem %s820_s1, %s670_s12  ;;  %s699_s16 = sld [smem:[#allocation3 + $0x284]]  ;;  %v213_v4 = vld [vmem:[%s212_s26] sm:$0x1] }
  0x3c   :  { %v182_v2 = vadd.f32 %v181_v61, %v177_v63  ;;  %v204_v3 = vadd.f32 %v203_v62, %v199_v0  ;;  %s222_s9 = scalar_lea.vmem %s820_s1, %s679_s15  ;;  %s705_s0 = sld [smem:[#allocation3 + $0x285]]  ;;  %v218_v7 = vld [vmem:[%s217_s30] sm:$0x1] }
  0x3d   :  { %s229_s11 = scalar_lea.vmem %s820_s1, %s459_s18  ;;  %s710_s21 = sld [smem:[#allocation3 + $0x286]]  ;;  %v223_v12 = vld [vmem:[%s222_s9] sm:$0x1] }
  0x3e   :  { %183 = vst.msk [vmem:[%s821_s2 + $0x3] sm:$0x1] %vm56_vm0, %v182_v2  ;;  %v209_v5 = vadd.f32 %v208_v1, %v204_v3  ;;  %v230_v6 = vld [vmem:[%s229_s11] sm:$0x1]  ;;  %s234_s15 = scalar_lea.vmem %s820_s1, %s460_s6  ;;  %s719_s24 = sld [smem:[#allocation3 + $0x287]] }
  0x3f   :  { %v235_v8 = vld [vmem:[%s234_s15] sm:$0x1]  ;;  %s239_s27 = scalar_lea.vmem %s820_s1, %s461_s28  ;;  %s467_s3 = sld [smem:[#allocation3 + $0x300]] }
  0x40   :  { %v214_v9 = vadd.f32 %v213_v4, %v209_v5  ;;  %v236_v10 = vadd.f32 %v235_v8, %v230_v6  ;;  %v240_v11 = vld [vmem:[%s239_s27] sm:$0x1]  ;;  %s244_s23 = scalar_lea.vmem %s820_s1, %s462_s13  ;;  %s468_s6 = sld [smem:[#allocation3 + $0x301]] }
  0x41   :  { %v245_v13 = vld [vmem:[%s244_s23] sm:$0x1]  ;;  %s249_s5 = scalar_lea.vmem %s820_s1, %s699_s16  ;;  %s469_s30 = sld [smem:[#allocation3 + $0x302]] }
  0x42   :  { %v219_v14 = vadd.f32 %v218_v7, %v214_v9  ;;  %v241_v15 = vadd.f32 %v240_v11, %v236_v10  ;;  %s254_s7 = scalar_lea.vmem %s820_s1, %s705_s0  ;;  %s470_s14 = sld [smem:[#allocation3 + $0x303]]  ;;  %v250_v16 = vld [vmem:[%s249_s5] sm:$0x1] }
  0x43   :  { %s259_s13 = scalar_lea.vmem %s820_s1, %s710_s21  ;;  %s739_s25 = sld [smem:[#allocation3 + $0x304]]  ;;  %v255_v19 = vld [vmem:[%s254_s7] sm:$0x1] }
  0x44   :  { %v224_v17 = vadd.f32 %v223_v12, %v219_v14  ;;  %v246_v18 = vadd.f32 %v245_v13, %v241_v15  ;;  %s264_s16 = scalar_lea.vmem %s820_s1, %s719_s24  ;;  %s745_s20 = sld [smem:[#allocation3 + $0x305]]  ;;  %v260_v22 = vld [vmem:[%s259_s13] sm:$0x1] }
  0x45   :  { %s271_s0 = scalar_lea.vmem %s820_s1, %s467_s3  ;;  %s750_s18 = sld [smem:[#allocation3 + $0x306]]  ;;  %v265_v27 = vld [vmem:[%s264_s16] sm:$0x1] }
  0x46   :  { %225 = vst.msk [vmem:[%s821_s2 + $0x4] sm:$0x1] %vm56_vm0, %v224_v17  ;;  %v251_v20 = vadd.f32 %v250_v16, %v246_v18  ;;  %v272_v21 = vld [vmem:[%s271_s0] sm:$0x1]  ;;  %s276_s24 = scalar_lea.vmem %s820_s1, %s468_s6  ;;  %s759_s17 = sld [smem:[#allocation3 + $0x307]] }
  0x47   :  { %v277_v23 = vld [vmem:[%s276_s24] sm:$0x1]  ;;  %s281_s26 = scalar_lea.vmem %s820_s1, %s469_s30  ;;  %s475_s8 = sld [smem:[#allocation3 + $0x380]] }
  0x48   :  { %v256_v24 = vadd.f32 %v255_v19, %v251_v20  ;;  %v278_v25 = vadd.f32 %v277_v23, %v272_v21  ;;  %v282_v26 = vld [vmem:[%s281_s26] sm:$0x1]  ;;  %s286_s4 = scalar_lea.vmem %s820_s1, %s470_s14  ;;  %s476_s6 = sld [smem:[#allocation3 + $0x381]] }
  0x49   :  { %v287_v28 = vld [vmem:[%s286_s4] sm:$0x1]  ;;  %s291_s11 = scalar_lea.vmem %s820_s1, %s739_s25  ;;  %s477_s13 = sld [smem:[#allocation3 + $0x382]] }
  0x4a   :  { %v261_v29 = vadd.f32 %v260_v22, %v256_v24  ;;  %v283_v30 = vadd.f32 %v282_v26, %v278_v25  ;;  %s296_s12 = scalar_lea.vmem %s820_s1, %s745_s20  ;;  %s478_s29 = sld [smem:[#allocation3 + $0x383]]  ;;  %v292_v31 = vld [vmem:[%s291_s11] sm:$0x1] }
  0x4b   :  { %s301_s14 = scalar_lea.vmem %s820_s1, %s750_s18  ;;  %s479_s19 = sld [smem:[#allocation3 + $0x384]]  ;;  %v297_v34 = vld [vmem:[%s296_s12] sm:$0x1] }
  0x4c   :  { %v266_v32 = vadd.f32 %v265_v27, %v261_v29  ;;  %v288_v33 = vadd.f32 %v287_v28, %v283_v30  ;;  %s306_s25 = scalar_lea.vmem %s820_s1, %s759_s17  ;;  %s480_s27 = sld [smem:[#allocation3 + $0x385]]  ;;  %v302_v37 = vld [vmem:[%s301_s14] sm:$0x1] }
  0x4d   :  { %s313_s3 = scalar_lea.vmem %s820_s1, %s475_s8  ;;  %s481_s20 = sld [smem:[#allocation3 + $0x386]]  ;;  %v307_v42 = vld [vmem:[%s306_s25] sm:$0x1] }
  0x4e   :  { %267 = vst.msk [vmem:[%s821_s2 + $0x5] sm:$0x1] %vm56_vm0, %v266_v32  ;;  %v293_v35 = vadd.f32 %v292_v31, %v288_v33  ;;  %v314_v36 = vld [vmem:[%s313_s3] sm:$0x1]  ;;  %s318_s28 = scalar_lea.vmem %s820_s1, %s476_s6  ;;  %s482_s4 = sld [smem:[#allocation3 + $0x387]] }
  0x4f   :  { %v319_v38 = vld [vmem:[%s318_s28] sm:$0x1]  ;;  %s323_s10 = scalar_lea.vmem %s820_s1, %s477_s13 }
  0x50   :  { %v298_v39 = vadd.f32 %v297_v34, %v293_v35  ;;  %v320_v40 = vadd.f32 %v319_v38, %v314_v36  ;;  %v324_v41 = vld [vmem:[%s323_s10] sm:$0x1]  ;;  %s328_s30 = scalar_lea.vmem %s820_s1, %s478_s29 }
  0x51   :  { %v329_v43 = vld [vmem:[%s328_s30] sm:$0x1]  ;;  %s333_s6 = scalar_lea.vmem %s820_s1, %s479_s19 }
  0x52   :  { %v303_v44 = vadd.f32 %v302_v37, %v298_v39  ;;  %v325_v45 = vadd.f32 %v324_v41, %v320_v40  ;;  %s338_s14 = scalar_lea.vmem %s820_s1, %s480_s27  ;;  %v334_v46 = vld [vmem:[%s333_s6] sm:$0x1] }
  0x53   :  { %s343_s21 = scalar_lea.vmem %s820_s1, %s481_s20  ;;  %v339_v49 = vld [vmem:[%s338_s14] sm:$0x1] }
  0x54   :  { %v308_v47 = vadd.f32 %v307_v42, %v303_v44  ;;  %v330_v48 = vadd.f32 %v329_v43, %v325_v45  ;;  %s348_s24 = scalar_lea.vmem %s820_s1, %s482_s4  ;;  %v344_v51 = vld [vmem:[%s343_s21] sm:$0x1] }
  0x55   :  { %v349_v53 = vld [vmem:[%s348_s24] sm:$0x1] }
  0x56   :  { %309 = vst.msk [vmem:[%s821_s2 + $0x6] sm:$0x1] %vm56_vm0, %v308_v47  ;;  %v335_v50 = vadd.f32 %v334_v46, %v330_v48 }
  0x58   :  { %v340_v52 = vadd.f32 %v339_v49, %v335_v50 }
  0x5a   :  { %v345_v54 = vadd.f32 %v344_v51, %v340_v52 }
  0x5c   :  { %v350_v55 = vadd.f32 %v349_v53, %v345_v54 }
  0x5e   :  { %351 = vst.msk [vmem:[%s821_s2 + $0x7] sm:$0x1] %vm56_vm0, %v350_v55 }

</bundles_post_ra>
